<compile_context>
chip_gen: v7x
topology: tpu7x:2x2x1
jax: 0.10.0
libtpu: 0.0.40
codegen_flags: <defaults>
</compile_context>

<pallas_src>
import jax
import jax.numpy as jnp
from jax.experimental import pallas as pl
from jax.experimental.pallas import tpu as pltpu

MARGIN = 2.0
EPS = 1e-6            # torch.nn.functional.pairwise_distance default eps

_LANE = 128
_ROW_ALIGN = 16       # multiple of 8 (f32) and 16 (bf16 sublane packing)
_TILE_BYTES = 2 * 1024 * 1024   # per-input-tile budget (x2 inputs x2 buffers ~ 8 MiB)
_MAX_TB = 512         # mem-bound kernels reach ~85% of HBM roofline at >=512-row tiles


def _round_up(x, m):
    return ((x + m - 1) // m) * m


def _make_kernel(tb, d_pad, d_real, b_real, margin):
    def kernel(x1_ref, x2_ref, lab_ref, o_ref):
        i = pl.program_id(0)

        x1 = x1_ref[...].astype(jnp.float32)        # (TB, D_pad)
        x2 = x2_ref[...].astype(jnp.float32)
        lab = lab_ref[...].astype(jnp.float32)      # (TB, 1)

        # pairwise_distance adds eps to the difference; add it only on real
        # (unpadded) feature columns so zero-padded columns contribute exactly 0.
        col = jax.lax.broadcasted_iota(jnp.int32, (1, d_pad), 1)
        eps_row = jnp.where(col < d_real, jnp.float32(EPS), jnp.float32(0.0))

        diff = x1 - x2 + eps_row                                 # (TB, D_pad)
        sq_sum = jnp.sum(diff * diff, axis=-1, keepdims=True)    # (TB, 1) == d^2
        dist = jnp.sqrt(sq_sum)                                  # EUP slot

        # use sq_sum directly for the similar-pair term (no sqrt -> re-square).
        per_row = (1.0 - lab) * sq_sum + lab * (margin - dist) ** 2

        # zero out batch-padding rows.
        row = i * tb + jax.lax.broadcasted_iota(jnp.int32, (tb, 1), 0)
        per_row = jnp.where(row < b_real, per_row, 0.0)

        partial = jnp.sum(per_row)

        # One lane-dense (1, 8, 128) block per tile: partial sum in [0, 0, 0],
        # zeros elsewhere; the wrapper just reads [:, 0, 0].
        r = jax.lax.broadcasted_iota(jnp.int32, (1, 8, _LANE), 1)
        c = jax.lax.broadcasted_iota(jnp.int32, (1, 8, _LANE), 2)
        o_ref[...] = jnp.where((r == 0) & (c == 0), partial, 0.0)

    return kernel


def contrastive_loss(output1, output2, label, margin=MARGIN,
                     max_rows_per_tile=_MAX_TB):
    """output1, output2: (B, D) float arrays (any float dtype); label: (B,) or (B, 1).

    Returns the scalar f32 contrastive loss, matching the PyTorch forward.
    """
    assert output1.shape == output2.shape and output1.ndim == 2
    B, D = output1.shape
    itemsize = output1.dtype.itemsize

    d_pad = _round_up(D, _LANE)

    # Tile sizing: VMEM-budgeted, sublane-aligned, never larger than (padded) B.
    tb_cap = max(_ROW_ALIGN,
                 (_TILE_BYTES // (d_pad * itemsize)) // _ROW_ALIGN * _ROW_ALIGN)
    tb_user = max(_ROW_ALIGN, (max_rows_per_tile // _ROW_ALIGN) * _ROW_ALIGN)
    tb = min(tb_user, tb_cap, _round_up(B, _ROW_ALIGN))
    b_pad = _round_up(B, tb)
    num_tiles = b_pad // tb

    # Zero-pad to aligned shapes (no-op when already aligned); keep native dtype.
    x1 = jnp.pad(output1, ((0, b_pad - B), (0, d_pad - D)))
    x2 = jnp.pad(output2, ((0, b_pad - B), (0, d_pad - D)))
    lab = jnp.pad(jnp.reshape(label, (B,)).astype(jnp.float32), (0, b_pad - B))
    lab = jnp.reshape(lab, (b_pad, 1))

    kernel = _make_kernel(tb, d_pad, D, B, float(margin))

    cost = pl.CostEstimate(
        flops=4 * b_pad * d_pad + 8 * b_pad,
        transcendentals=b_pad,
        bytes_accessed=2 * b_pad * d_pad * itemsize + b_pad * 4
        + num_tiles * 8 * _LANE * 4,
    )

    out = pl.pallas_call(
        kernel,
        out_shape=jax.ShapeDtypeStruct((num_tiles, 8, _LANE), jnp.float32),
        grid_spec=pltpu.PrefetchScalarGridSpec(
            num_scalar_prefetch=0,
            grid=(num_tiles,),
            in_specs=[
                pl.BlockSpec((tb, d_pad), lambda i: (i, 0)),
                pl.BlockSpec((tb, d_pad), lambda i: (i, 0)),
                pl.BlockSpec((tb, 1), lambda i: (i, 0)),
            ],
            out_specs=pl.BlockSpec((1, 8, _LANE), lambda i: (i, 0, 0)),
        ),
        compiler_params=pltpu.CompilerParams(
            dimension_semantics=("parallel",),
        ),
        cost_estimate=cost,
    )(x1, x2, lab)

    return jnp.sum(out[:, 0, 0]) / jnp.float32(B)


def _reference_loss(output1, output2, label, margin=MARGIN):
    # Pure-JAX reference of the PyTorch forward (for sanity check).
    x1 = output1.astype(jnp.float32)
    x2 = output2.astype(jnp.float32)
    diff = x1 - x2 + EPS
    dist = jnp.sqrt(jnp.sum(diff * diff, axis=-1))
    lab = jnp.reshape(label, (-1,)).astype(jnp.float32)
    return jnp.mean((1.0 - lab) * dist**2 + lab * (margin - dist) ** 2)


if __name__ == "__main__":
    # Case 1: small unaligned shapes (exercises batch + feature zero-padding).
    k1, k2, k3 = jax.random.split(jax.random.PRNGKey(0), 3)
    B, D = 8, 32
    o1 = jax.random.normal(k1, (B, D), dtype=jnp.float32)
    o2 = jax.random.normal(k2, (B, D), dtype=jnp.float32)
    lb = jax.random.bernoulli(k3, 0.5, (B,)).astype(jnp.float32)

    loss = contrastive_loss(o1, o2, lb)
    jax.block_until_ready(loss)
    ref = _reference_loss(o1, o2, lb)
    assert jnp.allclose(loss, ref, rtol=1e-5, atol=1e-5), (loss, ref)

    # Case 2: bf16 inputs stay bf16 across the call boundary + multi-tile
    # (parallel partial-sum path) via a small max_rows_per_tile.
    k4, k5, k6 = jax.random.split(jax.random.PRNGKey(1), 3)
    B2, D2 = 40, 160
    o1b = jax.random.normal(k4, (B2, D2), dtype=jnp.bfloat16)
    o2b = jax.random.normal(k5, (B2, D2), dtype=jnp.bfloat16)
    lb2 = jax.random.bernoulli(k6, 0.5, (B2,)).astype(jnp.float32)

    loss2 = contrastive_loss(o1b, o2b, lb2, max_rows_per_tile=16)
    jax.block_until_ready(loss2)
    ref2 = _reference_loss(o1b, o2b, lb2)
    assert jnp.allclose(loss2, ref2, rtol=1e-4, atol=1e-4), (loss2, ref2)

    print("KERNEL_OK")
</pallas_src>

<mosaic_0001>
module attributes {stable_mosaic.version = 11 : i64} {
  func.func @kernel(%arg0: i32, %arg1: memref<16x128xf32, #tpu.memory_space<vmem>>, %arg2: memref<16x128xf32, #tpu.memory_space<vmem>>, %arg3: memref<16x1xf32, #tpu.memory_space<vmem>>, %arg4: memref<1x8x128xf32, #tpu.memory_space<vmem>>) attributes {dimension_semantics = [#tpu.dimension_semantics<parallel>], iteration_bounds = array<i64: 1>, scalar_prefetch = 0 : i64, scratch_operands = 0 : i64, tpu.core_type = #tpu.core_type<tc>, window_params = [{transform_indices = @transform_0, window_bounds = array<i64: 16, 128>}, {transform_indices = @transform_1, window_bounds = array<i64: 16, 128>}, {transform_indices = @transform_2, window_bounds = array<i64: 16, 1>}, {transform_indices = @transform_3, window_bounds = array<i64: 1, 8, 128>}]} {
    %c0 = arith.constant 0 : index
    %c0_0 = arith.constant 0 : index
    %0 = vector.load %arg1[%c0, %c0_0] : memref<16x128xf32, #tpu.memory_space<vmem>>, vector<16x128xf32>
    %c0_1 = arith.constant 0 : index
    %c0_2 = arith.constant 0 : index
    %1 = vector.load %arg2[%c0_1, %c0_2] : memref<16x128xf32, #tpu.memory_space<vmem>>, vector<16x128xf32>
    %c0_3 = arith.constant 0 : index
    %c0_4 = arith.constant 0 : index
    %2 = vector.load %arg3[%c0_3, %c0_4] : memref<16x1xf32, #tpu.memory_space<vmem>>, vector<16x1xf32>
    %3 = tpu.iota {dimensions = array<i32: 1>} : vector<1x128xi32>
    %c32_i32 = arith.constant 32 : i32
    %4 = vector.broadcast %c32_i32 : i32 to vector<1x128xi32>
    %5 = arith.cmpi slt, %3, %4 : vector<1x128xi32>
    %cst = arith.constant 9.99999997E-7 : f32
    %cst_5 = arith.constant 0.000000e+00 : f32
    %6 = vector.broadcast %cst : f32 to vector<1x128xf32>
    %7 = vector.broadcast %cst_5 : f32 to vector<1x128xf32>
    %8 = arith.select %5, %6, %7 : vector<1x128xi1>, vector<1x128xf32>
    %9 = arith.subf %0, %1 : vector<16x128xf32>
    %10 = vector.broadcast %8 : vector<1x128xf32> to vector<16x128xf32>
    %11 = arith.addf %9, %10 : vector<16x128xf32>
    %12 = arith.mulf %11, %11 : vector<16x128xf32>
    %cst_6 = arith.constant dense<0.000000e+00> : vector<16xf32>
    %13 = vector.multi_reduction <add>, %12, %cst_6 [1] : vector<16x128xf32> to vector<16xf32>
    %14 = vector.shape_cast %13 : vector<16xf32> to vector<16x1xf32>
    %15 = math.sqrt %14 : vector<16x1xf32>
    %cst_7 = arith.constant 1.000000e+00 : f32
    %16 = vector.broadcast %cst_7 : f32 to vector<16x1xf32>
    %17 = arith.subf %16, %2 : vector<16x1xf32>
    %18 = arith.mulf %17, %14 : vector<16x1xf32>
    %cst_8 = arith.constant 2.000000e+00 : f32
    %19 = vector.broadcast %cst_8 : f32 to vector<16x1xf32>
    %20 = arith.subf %19, %15 : vector<16x1xf32>
    %21 = arith.mulf %20, %20 : vector<16x1xf32>
    %22 = arith.mulf %2, %21 : vector<16x1xf32>
    %23 = arith.addf %18, %22 : vector<16x1xf32>
    %c16_i32 = arith.constant 16 : i32
    %24 = arith.muli %arg0, %c16_i32 : i32
    %25 = tpu.iota {dimensions = array<i32: 0>} : vector<16x1xi32>
    %26 = vector.broadcast %24 : i32 to vector<16x1xi32>
    %27 = arith.addi %26, %25 : vector<16x1xi32>
    %c8_i32 = arith.constant 8 : i32
    %28 = vector.broadcast %c8_i32 : i32 to vector<16x1xi32>
    %29 = arith.cmpi slt, %27, %28 : vector<16x1xi32>
    %cst_9 = arith.constant 0.000000e+00 : f32
    %30 = vector.broadcast %cst_9 : f32 to vector<16x1xf32>
    %31 = arith.select %29, %23, %30 : vector<16x1xi1>, vector<16x1xf32>
    %32 = vector.shape_cast %31 : vector<16x1xf32> to vector<1x16x1xf32>
    %cst_10 = arith.constant dense<0.000000e+00> : vector<1xf32>
    %33 = vector.multi_reduction <add>, %32, %cst_10 [1, 2] : vector<1x16x1xf32> to vector<1xf32>
    %34 = vector.shape_cast %33 : vector<1xf32> to vector<1x1x1xf32>
    %35 = vector.extract %34[0, 0, 0] : f32 from vector<1x1x1xf32>
    %36 = tpu.iota {dimensions = array<i32: 1>} : vector<1x8x128xi32>
    %37 = tpu.iota {dimensions = array<i32: 2>} : vector<1x8x128xi32>
    %c0_i32 = arith.constant 0 : i32
    %38 = vector.broadcast %c0_i32 : i32 to vector<1x8x128xi32>
    %39 = arith.cmpi eq, %36, %38 : vector<1x8x128xi32>
    %c0_i32_11 = arith.constant 0 : i32
    %40 = vector.broadcast %c0_i32_11 : i32 to vector<1x8x128xi32>
    %41 = arith.cmpi eq, %37, %40 : vector<1x8x128xi32>
    %42 = arith.andi %39, %41 : vector<1x8x128xi1>
    %cst_12 = arith.constant 0.000000e+00 : f32
    %43 = vector.broadcast %35 : f32 to vector<1x8x128xf32>
    %44 = vector.broadcast %cst_12 : f32 to vector<1x8x128xf32>
    %45 = arith.select %42, %43, %44 : vector<1x8x128xi1>, vector<1x8x128xf32>
    %c0_13 = arith.constant 0 : index
    %c0_14 = arith.constant 0 : index
    %c0_15 = arith.constant 0 : index
    %46 = vector.load %arg4[%c0_13, %c0_14, %c0_15] : memref<1x8x128xf32, #tpu.memory_space<vmem>>, vector<1x8x128xf32>
    tpu.vector_store %arg4[%c0_13, %c0_14, %c0_15], %45 {strides = array<i32>} : memref<1x8x128xf32, #tpu.memory_space<vmem>>, vector<1x8x128xf32>,
    return
  }
  func.func @transform_0(%arg0: i32) -> (i32, i32) {
    %c0_i32 = arith.constant 0 : i32
    %c0_i32_0 = arith.constant 0 : i32
    return %arg0, %c0_i32 : i32, i32
  }
  func.func @transform_1(%arg0: i32) -> (i32, i32) {
    %c0_i32 = arith.constant 0 : i32
    %c0_i32_0 = arith.constant 0 : i32
    return %arg0, %c0_i32 : i32, i32
  }
  func.func @transform_2(%arg0: i32) -> (i32, i32) {
    %c0_i32 = arith.constant 0 : i32
    %c0_i32_0 = arith.constant 0 : i32
    return %arg0, %c0_i32 : i32, i32
  }
  func.func @transform_3(%arg0: i32) -> (i32, i32, i32) {
    %c0_i32 = arith.constant 0 : i32
    %c0_i32_0 = arith.constant 0 : i32
    %c0_i32_1 = arith.constant 0 : i32
    return %arg0, %c0_i32, %c0_i32_0 : i32, i32, i32
  }
}

</mosaic_0001>

<bundles_post_ra>
// kernel: tpu_custom_call.1
= control target key start
LH: loop header
LB: loop body
LE: loop exit
PB: predicated region body
PF: predicated region fallthrough
CT: control target
= control target key end

     0   :  { %8 = vsyncpa [#allocation3], 0  ;;  %s232_s0 = inlined_call_operand.vmem [shape: f32[16,128], index: 0, kind: input, shape index: {}]   ;;  %s233_s1 = inlined_call_operand.hbm [shape: f32[16,128], index: 1, kind: input, shape index: {}]   ;;  %s234_s2 = inlined_call_operand.vmem [shape: f32[16,1], index: 2, kind: input, shape index: {}]   ;;  %s235_s3 = inlined_call_operand.hbm [shape: f32[1,8,128], index: 3, kind: output, shape index: {}]  }
   0x1   :  { %9 = vsyncpa [#allocation4], 0  ;;  %s177_s12 = smov [#allocation2]   ;;  %s129_s16 = scalar_lea.hbm %s233_s1, 256 }
   0x2   :  { %s17_s13 = sshll.u32 %s177_s12, 4  ;;  %p130_p0 = scmp.ne.s32.totalorder %s233_s1, %s129_s16  ;;  %s18_s13 = int_to_ptr.vmem [resolvable:$true] %s17_s13 }
   0x3   :  { %p133_p1 = scmp.lt.u32.totalorder %s129_s16, %s233_s1 }
   0x5   :  { %p135_p2 = pnand %p133_p1, %p130_p0 }
   0x7   :  { %138 = shalt.err (!%p135_p2)
}
   0x8   :  { %s139_s21 = scalar_lea.vmem %s18_s13, 256  ;;  %p144_p4 = scmp.lt.s32.totalorder %s18_s13, %s18_s13 }
   0x9   :  { %p140_p3 = scmp.ne.s32.totalorder %s18_s13, %s139_s21  ;;  %p145_p5 = scmp.lt.s32.totalorder %s139_s21, %s139_s21 }
   0xb   :  { %p146_p6 = por %p145_p5, %p144_p4 }
   0xd   :  { %p147_p7 = pnand %p146_p6, %p140_p3 }
   0xf   :  { %150 = shalt.err (!%p147_p7)
}
  0x10   :  { %s178_s22 = smov 128   ;;  %s179_s23 = smov 8  }
  0x11   :  { %23 = dma.hbm_to_vmem [thread:$0]  %s233_s1, 256, %s18_s13, [#allocation3], %s178_s22, %s178_s22, %s179_s23  }
  0x12   :  { %173 = dma.done.wait [#allocation3], 256  }
  0x13   :  { %174 = vsyncadd [#allocation3], 4294967040  ;;  %v35_v0 = vlaneseq  ;;  %v29_v2 = vld [vmem:[%s232_s0] sm:$0xff]  ;;  %v180_v4 = vmov 0.0   ;;  %vm86_vm3 = vcmask 7168   ;;  %s181_s0 = smov [#allocation5]  }
  0x14   :  { %v31_v3 = vld [vmem:[#allocation2] sm:$0xff] }
  0x15   :  { %v36_v1 = vand.u32 127, %v35_v0  ;;  %v39_v6 = vsub.f32 %v29_v2, %v31_v3  ;;  %v33_v12 = vld [vmem:[%s234_s2] sm:$0xff]  ;;  %v77_v30 = vshrl.u32 %v35_v0, 7  ;;  %s111_s2 = sshll.u32 %s181_s0, 4  ;;  %s112_s2 = int_to_ptr.vmem [resolvable:$true] %s111_s2 }
  0x16   :  { %v63_v16 = vsub.f32 1.0, %v33_v12  ;;  %s151_s30 = scalar_lea.vmem %s112_s2, 128  ;;  %p156_p9 = scmp.lt.s32.totalorder %s112_s2, %s112_s2 }
  0x17   :  { %vm37_vm0 = vcmp.lt.s32.totalorder %v36_v1, 32  ;;  %vm99_vm4 = vcmp.eq.s32.totalorder %v77_v30, 0  ;;  %vm100_vm5 = vcmp.eq.s32.totalorder %v36_v1, 0  ;;  %p152_p8 = scmp.ne.s32.totalorder %s112_s2, %s151_s30  ;;  %p157_p10 = scmp.lt.s32.totalorder %s151_s30, %s151_s30 }
  0x18   :  { %v38_v5 = vsel %vm37_vm0, 1e-06, %v180_v4  ;;  %vm101_vm6 = vmand %vm99_vm4, %vm100_vm5 }
  0x19   :  { %v41_v7 = vadd.f32 %v39_v6, %v38_v5  ;;  %p158_p11 = por %p157_p10, %p156_p9 }
  0x1b   :  { %v43_v8 = vmul.f32 %v41_v7, %v41_v7  ;;  %p159_p12 = pnand %p158_p11, %p152_p8 }
  0x1d   :  { %45 = vadd.xlane.f32.xlu0 %v43_v8 }
  0xaa   :  { %v46_v9 = vpop.xlane.xlu0 %45 }
  0xab   :  { %127 = vrsqrt.f32 %v46_v9  ;;  %vm51_vm1 = vcmp.eq.f32.partialorder %v46_v9, inf  ;;  %v54_v13 = vand.u32 2147483648, %v46_v9  ;;  %vm53_vm2 = vcmp.eq.f32.partialorder %v46_v9, 0.0 }
  0xac   :  { %v65_v19 = vmul.f32 %v63_v16, %v46_v9 }
  0xb5   :  { %v128_v10 = vpop.eup %127 }
  0xb6   :  { %v50_v11 = vmul.f32 %v128_v10, %v46_v9 }
  0xb8   :  { %v52_v14 = vsel %vm51_vm1, %v46_v9, %v50_v11 }
  0xb9   :  { %v55_v15 = vsel %vm53_vm2, %v54_v13, %v52_v14 }
  0xba   :  { %v67_v17 = vsub.f32 2.0, %v55_v15 }
  0xbc   :  { %v69_v18 = vmul.f32 %v67_v17, %v67_v17 }
  0xbe   :  { %v71_v20 = vmul.f32 %v69_v18, %v33_v12 }
  0xc0   :  { %v73_v21 = vadd.f32 %v71_v20, %v65_v19 }
  0xc2   :  { %v87_v22 = vsel %vm86_vm3, %v73_v21, 0.0 }
  0xc3   :  { %90 = vadd.xlane.f32.xlu0 %v87_v22 }
 0x150   :  { %v91_v23 = vpop.xlane.xlu0 %90 }
 0x151   :  { %v92_v24 = vrot.slane %v91_v23, 4 }
 0x153   :  { %v93_v25 = vadd.f32 %v92_v24, %v91_v23 }
 0x155   :  { %v94_v26 = vrot.slane %v93_v25, 2 }
 0x157   :  { %v95_v27 = vadd.f32 %v94_v26, %v93_v25 }
 0x159   :  { %v96_v28 = vrot.slane %v95_v27, 1 }
 0x15b   :  { %v97_v29 = vadd.f32 %v96_v28, %v95_v27 }
 0x15d   :  { %120 = vpush %v97_v29 }
 0x18e   :  { %s121_s29 = spop %120 }
 0x18f   :  { %v102_v31 = vstv %s121_s29 }
 0x190   :  { %v103_v32 = vsel %vm101_vm6, %v102_v31, 0.0 }
 0x191   :  { %104 = vst [vmem:[#allocation5] sm:$0xff] %v103_v32 }
 0x192   :  { %162 = shalt.err (!%p159_p12)
}
 0x193   :  { %s163_s6 = scalar_lea.hbm %s235_s3, 128 }
 0x194   :  { %p164_p13 = scmp.ne.s32.totalorder %s235_s3, %s163_s6  ;;  %p167_p0 = scmp.lt.u32.totalorder %s163_s6, %s235_s3 }
 0x196   :  { %p169_p1 = pnand %p167_p0, %p164_p13 }
 0x198   :  { %172 = shalt.err (!%p169_p1)
}
 0x199   :  { %114 = dma.vmem_to_hbm [thread:$0]  %s112_s2, 128, %s235_s3, [#allocation4]  }
 0x19a   :  { %175 = dma.done.wait [#allocation4], 128  }
 0x19b   :  { %176 = vsyncadd [#allocation4], 4294967168 }
 0x19c   :  { %118 = vsyncpa [#allocation3], 1 }
 0x19d   :  { %119 = vsyncpa [#allocation4], 1 }

</bundles_post_ra>
